<compile_context>
chip_gen: v7x
topology: tpu7x:2x2x1
jax: 0.10.0
libtpu: 0.0.40
codegen_flags: <defaults>
</compile_context>

<pallas_src>
import functools

import jax
import jax.numpy as jnp
from jax import lax
from jax.experimental import pallas as pl
from jax.experimental.pallas import tpu as pltpu


def _pool_concat_kernel(x_ref, p_ref, o_ref, *, inv_area, precision):
    """x_ref: (tn, C, H*W); p_ref: (H*W, Ho*Wo); o_ref: (tn, 2, C, Ho*Wo)."""
    tn, c, hw = x_ref.shape
    howo = p_ref.shape[1]
    x2d = x_ref[...].reshape(tn * c, hw)              # free when C % 8 == 0
    acc = jnp.dot(x2d, p_ref[...], preferred_element_type=jnp.float32,
                  precision=precision)
    o_ref[:, 0, :, :] = (acc * inv_area).reshape(tn, c, howo).astype(o_ref.dtype)
    o_ref[:, 1, :, :] = jnp.zeros((tn, c, howo), o_ref.dtype)  # folded zero half


def _pool_matrix(h, w, ho, wo, stride, dtype):
    """0/1 matrix P of shape (H*W, Ho*Wo): P[hi*W+wi, oh*Wo+ow] = 1 iff the
    input pixel (hi, wi) belongs to pooling window (oh, ow) (floor semantics)."""
    hi = jnp.arange(h)
    wi = jnp.arange(w)
    mh = (hi[:, None] // stride == jnp.arange(ho)[None, :]) & (
        hi[:, None] < ho * stride)                    # (H, Ho)
    mw = (wi[:, None] // stride == jnp.arange(wo)[None, :]) & (
        wi[:, None] < wo * stride)                    # (W, Wo)
    p = mh[:, None, :, None] & mw[None, :, None, :]   # (H, W, Ho, Wo)
    return p.reshape(h * w, ho * wo).astype(dtype)    # exact 0/1 in any dtype


def _vmem_capacity_bytes():
    try:
        return int(pltpu.get_tpu_info().vmem_capacity_bytes)
    except Exception:
        return 64 * 1024 * 1024                       # conservative (v7x-sized)


def _choose_images_per_step(n, c, hw, howo, in_bytes, out_bytes, p_bytes, budget):
    """Images per grid step so double-buffered in/out tiles plus the
    single-buffered pooling matrix fit the VMEM budget (real dtypes)."""
    per_image = c * (hw * in_bytes + 2 * howo * out_bytes) * 2  # 2x double-buffered
    avail = max(budget - p_bytes, per_image)
    tn = max(1, int(avail // per_image))
    if n >= 2:
        tn = min(tn, (n + 1) // 2)    # keep >= 2 grid steps so both v7x TCs get work
    tn = min(tn, n)
    while n % tn != 0:                # prefer a divisor of n: no padded last block
        tn -= 1
    return tn


def downsample_b(x, stride):
    """Pallas implementation of DownsampleB.forward (NCHW in, NCHW out)."""
    n, c, h, w = x.shape
    ho, wo = h // stride, w // stride
    hw, howo = h * w, ho * wo
    m = n * c
    out_dtype = x.dtype

    x_flat = x.reshape(n, c, hw)                      # free row-major reshape
    p = _pool_matrix(h, w, ho, wo, stride, x.dtype)
    inv_area = 1.0 / float(stride * stride)

    in_bytes = x.dtype.itemsize
    out_bytes = jnp.dtype(out_dtype).itemsize
    p_bytes = p.size * p.dtype.itemsize

    phys_vmem = _vmem_capacity_bytes()
    vmem_limit = min(phys_vmem // 2, 64 * 1024 * 1024)  # 32 MiB on v7x, 64 MiB on v5e/v6e
    budget = (vmem_limit * 5) // 8                      # headroom for compiler scratch
    # TODO(synk): for very large feature maps where P (H*W x Ho*Wo) no longer fits
    # VMEM, switch to separable (W then H) pooling matmuls / K-tiled accumulation.

    tn = _choose_images_per_step(n, c, hw, howo, in_bytes, out_bytes, p_bytes, budget)
    grid = (pl.cdiv(n, tn),)

    # P is exact 0/1, but default matmul precision may round f32 activations to
    # bf16 before the multiply; force full precision for f32 inputs.
    precision = (lax.Precision.HIGHEST if x.dtype == jnp.float32
                 else lax.Precision.DEFAULT)

    kernel = functools.partial(_pool_concat_kernel, inv_area=inv_area,
                               precision=precision)
    out = pl.pallas_call(
        kernel,
        out_shape=jax.ShapeDtypeStruct((n, 2, c, howo), out_dtype),
        grid=grid,
        in_specs=[
            pl.BlockSpec((tn, c, hw), lambda i: (i, 0, 0)),
            # Resident pooling matrix: constant index_map -> single-buffered.
            pl.BlockSpec((hw, howo), lambda i: (0, 0), pipeline_mode=pl.Buffered(1)),
        ],
        out_specs=pl.BlockSpec((tn, 2, c, howo), lambda i: (i, 0, 0, 0)),
        compiler_params=pltpu.CompilerParams(
            dimension_semantics=("parallel",),
            vmem_limit_bytes=int(vmem_limit),
        ),
        cost_estimate=pl.CostEstimate(
            flops=2 * m * hw * howo,
            transcendentals=0,
            bytes_accessed=m * hw * in_bytes + 2 * m * howo * out_bytes + p_bytes,
        ),
    )(x_flat, p)

    # (N, 2, C, Ho*Wo) -> (N, 2C, Ho, Wo) is a free row-major reshape: the zero
    # half already sits in the concat position, no extra XLA pass over HBM.
    return out.reshape(n, 2 * c, ho, wo)


def _reference(x, stride):
    n, c, h, w = x.shape
    ho, wo = h // stride, w // stride
    pooled = x[:, :, :ho * stride, :wo * stride].reshape(
        n, c, ho, stride, wo, stride).mean(axis=(3, 5))
    return jnp.concatenate([pooled, jnp.zeros_like(pooled)], axis=1)


if __name__ == "__main__":
    # DownsampleB(nIn=4, nOut=8, stride=2)  (expand_ratio is unused in forward)
    stride = 2
    key = jax.random.PRNGKey(0)
    x = jax.random.normal(key, (2, 4, 16, 16), dtype=jnp.float32)

    out = downsample_b(x, stride)
    out = jax.block_until_ready(out)

    ref = _reference(x, stride)
    assert out.shape == (2, 8, 8, 8), out.shape
    assert jnp.allclose(out, ref, atol=1e-5, rtol=1e-5), "mismatch vs reference"

    print("KERNEL_OK")
</pallas_src>

<mosaic_0001>
module attributes {stable_mosaic.version = 11 : i64} {
  func.func @_pool_concat_kernel(%arg0: i32, %arg1: memref<1x4x256xf32, #tpu.memory_space<vmem>>, %arg2: memref<256x64xf32, #tpu.memory_space<vmem>>, %arg3: memref<1x2x4x64xf32, #tpu.memory_space<vmem>>) attributes {dimension_semantics = [#tpu.dimension_semantics<parallel>], iteration_bounds = array<i64: 2>, scalar_prefetch = 0 : i64, scratch_operands = 0 : i64, tpu.core_type = #tpu.core_type<tc>, window_params = [{transform_indices = @transform_0, window_bounds = array<i64: 1, 4, 256>}, {pipeline_mode = #tpu.pipeline_mode<synchronous>, transform_indices = @transform_1, window_bounds = array<i64: 256, 64>}, {transform_indices = @transform_2, window_bounds = array<i64: 1, 2, 4, 64>}]} {
    %c0 = arith.constant 0 : index
    %c0_0 = arith.constant 0 : index
    %c0_1 = arith.constant 0 : index
    %0 = vector.load %arg1[%c0, %c0_0, %c0_1] : memref<1x4x256xf32, #tpu.memory_space<vmem>>, vector<1x4x256xf32>
    %1 = vector.shape_cast %0 : vector<1x4x256xf32> to vector<4x256xf32>
    %c0_2 = arith.constant 0 : index
    %c0_3 = arith.constant 0 : index
    %2 = vector.load %arg2[%c0_2, %c0_3] : memref<256x64xf32, #tpu.memory_space<vmem>>, vector<256x64xf32>
    %cst = arith.constant dense<0.000000e+00> : vector<4x64xf32>
    %3 = tpu.matmul %1, %2, %cst {dimension_numbers = #tpu.dot_dimension_numbers<[1], [0], [0], [1], [0, 0, 1, 1], [], []>, precision = #tpu.contract_precision<fp32>} : vector<4x256xf32>, vector<256x64xf32>, vector<4x64xf32> -> vector<4x64xf32>
    %cst_4 = arith.constant 2.500000e-01 : f32
    %4 = vector.broadcast %cst_4 : f32 to vector<4x64xf32>
    %5 = arith.mulf %3, %4 : vector<4x64xf32>
    %6 = vector.shape_cast %5 : vector<4x64xf32> to vector<1x4x64xf32>
    %c0_5 = arith.constant 0 : index
    %c0_6 = arith.constant 0 : index
    %c0_7 = arith.constant 0 : index
    %c0_8 = arith.constant 0 : index
    %7 = vector.load %arg3[%c0_5, %c0_6, %c0_7, %c0_8] : memref<1x2x4x64xf32, #tpu.memory_space<vmem>>, vector<1x1x4x64xf32>
    %8 = vector.shape_cast %7 : vector<1x1x4x64xf32> to vector<1x4x64xf32>
    %9 = vector.shape_cast %6 : vector<1x4x64xf32> to vector<1x1x4x64xf32>
    tpu.vector_store %arg3[%c0_5, %c0_6, %c0_7, %c0_8], %9 {strides = array<i32>} : memref<1x2x4x64xf32, #tpu.memory_space<vmem>>, vector<1x1x4x64xf32>,
    %cst_9 = arith.constant 0.000000e+00 : f32
    %10 = vector.broadcast %cst_9 : f32 to vector<1x4x64xf32>
    %c0_10 = arith.constant 0 : index
    %c1 = arith.constant 1 : index
    %c0_11 = arith.constant 0 : index
    %c0_12 = arith.constant 0 : index
    %11 = vector.load %arg3[%c0_10, %c1, %c0_11, %c0_12] : memref<1x2x4x64xf32, #tpu.memory_space<vmem>>, vector<1x1x4x64xf32>
    %12 = vector.shape_cast %11 : vector<1x1x4x64xf32> to vector<1x4x64xf32>
    %13 = vector.shape_cast %10 : vector<1x4x64xf32> to vector<1x1x4x64xf32>
    tpu.vector_store %arg3[%c0_10, %c1, %c0_11, %c0_12], %13 {strides = array<i32>} : memref<1x2x4x64xf32, #tpu.memory_space<vmem>>, vector<1x1x4x64xf32>,
    return
  }
  func.func @transform_0(%arg0: i32) -> (i32, i32, i32) {
    %c0_i32 = arith.constant 0 : i32
    %c0_i32_0 = arith.constant 0 : i32
    %c0_i32_1 = arith.constant 0 : i32
    return %arg0, %c0_i32, %c0_i32_0 : i32, i32, i32
  }
  func.func @transform_1(%arg0: i32) -> (i32, i32) {
    %c0_i32 = arith.constant 0 : i32
    %c0_i32_0 = arith.constant 0 : i32
    %c0_i32_1 = arith.constant 0 : i32
    return %c0_i32, %c0_i32_0 : i32, i32
  }
  func.func @transform_2(%arg0: i32) -> (i32, i32, i32, i32) {
    %c0_i32 = arith.constant 0 : i32
    %c0_i32_0 = arith.constant 0 : i32
    %c0_i32_1 = arith.constant 0 : i32
    %c0_i32_2 = arith.constant 0 : i32
    return %arg0, %c0_i32, %c0_i32_0, %c0_i32_1 : i32, i32, i32, i32
  }
}

</mosaic_0001>

<bundles_post_ra>
// kernel: tpu_custom_call.1
= control target key start
LH: loop header
LB: loop body
LE: loop exit
PB: predicated region body
PF: predicated region fallthrough
CT: control target
= control target key end

     0   :  { %7 = vsyncpa [#allocation3], 0  ;;  %s2279_s0 = inlined_call_operand.vmem [shape: f32[2,4,256], index: 0, kind: input, shape index: {}]   ;;  %s2280_s1 = inlined_call_operand.vmem [shape: f32[256,64], index: 1, kind: input, shape index: {}]   ;;  %s2281_s2 = inlined_call_operand.hbm [shape: f32[2,2,4,64], index: 2, kind: output, shape index: {}]  }
   0x1   :  { %9 = vsyncpa [#allocation3 + $0x1], 0  ;;  %s1664_s9 = smov 0   ;;  %s1666_s10 = smov 0  }
   0x2   :  { %s1668_s11 = smov 0   ;;  %s1670_s12 = smov 0  }
   0x3 LB: > { %s1685_s13 = sadd.s32 4294967295, %s1643_s12   ;;  %s1121_s14 = sadd.s32 4294967294, %s1643_s12   ;;  %s1643_s12 = sphi %s1670_s12, %s2373_s12   ;;  %s1639_s11 = sphi %s1668_s11, %s2372_s11   ;;  %s1635_s10 = sphi %s1666_s10, %s2371_s10   ;;  %s1631_s9 = sphi %s1664_s9, %s2370_s9  }
   0x4   : > { %s1689_s15 = sadd.s32 1, %s1643_s12   ;;  %s69_s16 = sadd.s32 1, %s1639_s11 }
   0x5   : > { %s66_s17 = ssub.s32 %s1643_s12, %s1689_s15  ;;  %p79_p0 = scmp.ne.s32.totalorder %s1639_s11, %s1635_s10 }
   0x6   : > { %p67_p1 = scmp.eq.s32.totalorder %s66_s17, 0  ;;  %p80_p2 = scmp.eq.s32.totalorder %s1685_s13, 1 }
   0x7   : > { %p85_p3 = scmp.ne.s32.totalorder %s1635_s10, %s1631_s9  ;;  %p86_p4 = scmp.eq.s32.totalorder %s1121_s14, 1 }
   0x8   : > { %s1700_s18 = scalar_select %p67_p1, %s1639_s11, %s69_s16  }
   0x9   : > { %p1702_p5 = por %p80_p2, %p79_p0  ;;  %p1706_p6 = por %p86_p4, %p85_p3 }
   0xa   : > { %p1124_p7 = scmp.ge.s32.totalorder %s1643_s12, 1  ;;  %p115_p8 = scmp.lt.s32.totalorder %s1643_s12, 3 }
   0xc   : > { %p116_p9 = pnand %p1124_p7, %p115_p8 }
   0xe   : > { %119 = sbr.rel (%p116_p9) target bundleno = 379 (0x17b), region = 28 }
  0x15   : > { %v159_v0 = vld [vmem:[%s2280_s1 + $0x80] sm:$0xff]  ;;  %v160_v1 = vld [vmem:[%s2280_s1 + $0x88] sm:$0xff]  ;;  %v161_v7 = vld [vmem:[%s2280_s1 + $0x90] sm:$0xff]  ;;  %p137_p10 = scmp.lt.s32.totalorder %s1685_s13, 1  ;;  %s134_s5 = sand.u32 1, %s1635_s10   ;;  %vm1041_vm0 = vcmask 519168  }
  0x16   : > { %v143_v2 = vld [vmem:[%s2280_s1] sm:$0xff]  ;;  %v227_v3 = vand.u32 4294901760, %v159_v0  ;;  %v230_v4 = vand.u32 4294901760, %v160_v1  ;;  %v144_v5 = vld [vmem:[%s2280_s1 + $0x8] sm:$0xff]  ;;  %v162_v8 = vld [vmem:[%s2280_s1 + $0x98] sm:$0xff]  ;;  %v233_v10 = vand.u32 4294901760, %v161_v7 }
  0x17   : > { %v179_v6 = vand.u32 4294901760, %v143_v2  ;;  %v182_v9 = vand.u32 4294901760, %v144_v5  ;;  %v236_v11 = vand.u32 4294901760, %v162_v8  ;;  %v145_v12 = vld [vmem:[%s2280_s1 + $0x10] sm:$0xff]  ;;  %v146_v13 = vld [vmem:[%s2280_s1 + $0x18] sm:$0xff]  ;;  %v163_v18 = vld [vmem:[%s2280_s1 + $0xa0] sm:$0xff] }
  0x18   : > { %v1736_v14 = vpack.c.bf16 %v230_v4, %v227_v3  ;;  %v185_v16 = vand.u32 4294901760, %v145_v12  ;;  %v188_v17 = vand.u32 4294901760, %v146_v13  ;;  %v164_v19 = vld [vmem:[%s2280_s1 + $0xa8] sm:$0xff]  ;;  %v147_v23 = vld [vmem:[%s2280_s1 + $0x20] sm:$0xff]  ;;  %v1759_v25 = vsub.f32 %v161_v7, %v233_v10  ;;  %v165_v37 = vld [vmem:[%s2280_s1 + $0xb0] sm:$0xff]  ;;  %s1936_s14 = scalar_select %p137_p10, %s1685_s13, 1 }
  0x19   : > { %v1738_v15 = vsub.f32 %v143_v2, %v179_v6  ;;  %v1746_v20 = vpack.c.bf16 %v182_v9, %v179_v6  ;;  %v1748_v21 = vsub.f32 %v144_v5, %v182_v9  ;;  %v1750_v22 = vpack.c.bf16 %v236_v11, %v233_v10  ;;  %v148_v24 = vld [vmem:[%s2280_s1 + $0x28] sm:$0xff]  ;;  %v166_v42 = vld [vmem:[%s2280_s1 + $0xb8] sm:$0xff]  ;;  %v149_v55 = vld [vmem:[%s2280_s1 + $0x30] sm:$0xff]  ;;  %s1125_s6 = sshll.u32 %s134_s5, 3  ;;  %s1135_s8 = sshll.u32 %s1685_s13, 7 }
  0x1a   : > { %1347 = vmatprep.subr.bf16.mxu0 %v1736_v14  ;;  %v1761_v26 = vsub.f32 %v162_v8, %v236_v11  ;;  %v1763_v27 = vpack.c.bf16 %v188_v17, %v185_v16  ;;  %v1765_v28 = vsub.f32 %v145_v12, %v185_v16  ;;  %v239_v29 = vand.u32 4294901760, %v163_v18  ;;  %v150_v56 = vld [vmem:[%s2280_s1 + $0x38] sm:$0xff]  ;;  %v167_v5 = vld [vmem:[%s2280_s1 + $0xc0] sm:$0xff]  ;;  %v168_v6 = vld [vmem:[%s2280_s1 + $0xc8] sm:$0xff]  ;;  %s1134_s25 = sshll.u32 %s1936_s14, 3  ;;  %s2221_s7 = scalar_lea.vmem [#allocation2], %s1125_s6 }
  0x1b   : > { %1349 = vmatpush3.bf16.msra.mxu0 %v1746_v20  ;;  %v242_v30 = vand.u32 4294901760, %v164_v19  ;;  %v1768_v31 = vsub.f32 %v159_v0, %v227_v3  ;;  %v1770_v32 = vsub.f32 %v160_v1, %v230_v4  ;;  %v191_v33 = vand.u32 4294901760, %v147_v23  ;;  %v151_v11 = vld [vmem:[%s2280_s1 + $0x40] sm:$0xff]  ;;  %s141_s4 = scalar_lea.vmem %s2279_s0, %s1134_s25  ;;  %s1059_s14 = sshll.u32 %s2221_s7, 4  ;;  %s2232_s14 = int_to_ptr.vmem [resolvable:$true] %s1059_s14 }
  0x1c   : > { %1351 = vmatprep.subr.bf16.mxu0 %v1750_v22  ;;  %v194_v34 = vand.u32 4294901760, %v148_v24  ;;  %v2299_v35 = vand.u32 4294901760, %v1738_v15  ;;  %v2298_v36 = vand.u32 4294901760, %v1748_v21  ;;  %v1778_v38 = vsub.f32 %v146_v13, %v188_v17  ;;  %s2230_s21 = scalar_lea.hbm %s2281_s2, %s1135_s8  ;;  %s2238_s22 = scalar_lea.sflag [#allocation3], %s134_s5 }
  0x1d   : > { %v1780_v39 = vpack.c.bf16 %v242_v30, %v239_v29  ;;  %v1782_v40 = vsub.f32 %v163_v18, %v239_v29  ;;  %v2301_v41 = vand.u32 4294901760, %v1768_v31  ;;  %v1788_v43 = vsub.f32 %v164_v19, %v242_v30  ;;  %v152_v29 = vld [vmem:[%s2280_s1 + $0x48] sm:$0xff]  ;;  %s1581_s23 = scalar_lea.vmem %s2232_s14, 128  ;;  %s1646_s13 = smov [#allocation2]  }
  0x1e   : > { %v2300_v44 = vand.u32 4294901760, %v1770_v32  ;;  %v1791_v45 = vpack.c.bf16 %v194_v34, %v191_v33  ;;  %v1793_v46 = vsub.f32 %v147_v23, %v191_v33  ;;  %v294_v48 = vsub.f32 %v1738_v15, %v2299_v35  ;;  %p1582_p11 = scmp.ne.s32.totalorder %s2232_s14, %s1581_s23  ;;  %s1585_s24 = sshll.u32 %s1646_s13, 4  ;;  %s1586_s24 = int_to_ptr.vmem [resolvable:$false] %s1585_s24 }
  0x1f   : > { %1353 = vmatpush3.bf16.msra.mxu0 %v1763_v27  ;;  %v406_v47 = vsub.f32 %v1768_v31, %v2301_v41  ;;  %v301_v49 = vsub.f32 %v1748_v21, %v2298_v36  ;;  %v245_v50 = vand.u32 4294901760, %v165_v37  ;;  %v248_v52 = vand.u32 4294901760, %v166_v42  ;;  %v142_v41 = vld [vmem:[%s141_s4] sm:$0xff]  ;;  %s1587_s25 = scalar_lea.vmem %s1586_s24, 256  ;;  %p1588_p0 = scmp.lt.s32.totalorder %s2232_s14, %s1586_s24 }
  0x20   : > { %1355 = vmatprep.subr.bf16.mxu0 %v1780_v39  ;;  %v413_v51 = vsub.f32 %v1770_v32, %v2300_v44  ;;  %v2297_v53 = vand.u32 4294901760, %v1759_v25  ;;  %v2294_v54 = vand.u32 4294901760, %v1761_v26  ;;  %v1817_v58 = vsub.f32 %v148_v24, %v194_v34  ;;  %p1583_p12 = pnand %p1582_p11, %p1702_p5  ;;  %p1589_p1 = scmp.lt.s32.totalorder %s1587_s25, %s1581_s23 }
  0x21   : > { %v407_v57 = vand.u32 4294901760, %v406_v47  ;;  %v295_v59 = vand.u32 4294901760, %v294_v48  ;;  %v302_v60 = vand.u32 4294901760, %v301_v49  ;;  %v1819_v62 = vpack.c.bf16 %v248_v52, %v245_v50 }
  0x22   : > { %v414_v61 = vand.u32 4294901760, %v413_v51  ;;  %v1821_v63 = vsub.f32 %v165_v37, %v245_v50  ;;  %v420_v0 = vsub.f32 %v1759_v25, %v2297_v53  ;;  %v427_v2 = vsub.f32 %v1761_v26, %v2294_v54  ;;  %p1584_p13 = pneg %p1583_p12  ;;  %p1590_p2 = por %p1589_p1, %p1588_p0 }
  0x23   : > { %1357 = vmatpush3.bf16.msra.mxu0 %v1791_v45  ;;  %v1380_v1 = vpack.c.bf16 %v302_v60, %v295_v59  ;;  %v197_v3 = vand.u32 4294901760, %v149_v55  ;;  %v200_v4 = vand.u32 4294901760, %v150_v56  ;;  %v2293_v9 = vand.u32 4294901760, %v1765_v28 }
  0x24   : > { %v1378_v7 = vpack.c.bf16 %v414_v61, %v407_v57  ;;  %1359 = vmatprep.subr.bf16.mxu0 %v1819_v62  ;;  %v421_v8 = vand.u32 4294901760, %v420_v0  ;;  %v2290_v10 = vand.u32 4294901760, %v1778_v38  ;;  %v1842_v12 = vsub.f32 %v166_v42, %v248_v52  ;;  %v170_v57 = vld [vmem:[%s2280_s1 + $0xd8] sm:$0xff]  ;;  %p1591_p3 = pnand %p1590_p2, %p1584_p13 }
  0x25   : > { %v428_v13 = vand.u32 4294901760, %v427_v2  ;;  %v1844_v16 = vpack.c.bf16 %v200_v4, %v197_v3  ;;  %v1846_v17 = vsub.f32 %v149_v55, %v197_v3  ;;  %v308_v18 = vsub.f32 %v1765_v28, %v2293_v9 }
  0x26   : > { %1379 = vmatprep.subr.bf16.mxu1 %v1378_v7  ;;  %v315_v19 = vsub.f32 %v1778_v38, %v2290_v10  ;;  %v251_v23 = vand.u32 4294901760, %v167_v5  ;;  %v254_v24 = vand.u32 4294901760, %v168_v6  ;;  %v2289_v33 = vand.u32 4294901760, %v1782_v40 }
  0x27   : > { %1381 = vmatpush3.bf16.msra.mxu1 %v1380_v1  ;;  %v1382_v30 = vpack.c.bf16 %v428_v13, %v421_v8  ;;  %1361 = vmatpush3.bf16.msra.mxu0 %v1844_v16  ;;  %v2287_v34 = vand.u32 4294901760, %v1788_v43  ;;  %v203_v37 = vand.u32 4294901760, %v151_v11  ;;  %v1860_v42 = vsub.f32 %v150_v56, %v200_v4  ;;  %v169_v56 = vld [vmem:[%s2280_s1 + $0xd0] sm:$0xff] }
  0x28   : > { %v309_v47 = vand.u32 4294901760, %v308_v18  ;;  %v316_v48 = vand.u32 4294901760, %v315_v19  ;;  %v1862_v49 = vpack.c.bf16 %v254_v24, %v251_v23  ;;  %v1864_v50 = vsub.f32 %v167_v5, %v251_v23  ;;  %v153_v1 = vld [vmem:[%s2280_s1 + $0x50] sm:$0xff]  ;;  %v154_v18 = vld [vmem:[%s2280_s1 + $0x58] sm:$0xff] }
  0x29   : > { %1383 = vmatprep.subr.bf16.mxu1 %v1382_v30  ;;  %v434_v51 = vsub.f32 %v1782_v40, %v2289_v33  ;;  %v441_v52 = vsub.f32 %v1788_v43, %v2287_v34  ;;  %v206_v55 = vand.u32 4294901760, %v152_v29  ;;  %v1879_v60 = vsub.f32 %v168_v6, %v254_v24 }
  0x2a   : > { %v1384_v59 = vpack.c.bf16 %v316_v48, %v309_v47  ;;  %1363 = vmatprep.subr.bf16.mxu0 %v1862_v49  ;;  %v2286_v61 = vand.u32 4294901760, %v1793_v46  ;;  %v2284_v0 = vand.u32 4294901760, %v1817_v58  ;;  %v1888_v5 = vsub.f32 %v151_v11, %v203_v37 }
  0x2b   : > { %v435_v2 = vand.u32 4294901760, %v434_v51  ;;  %v442_v3 = vand.u32 4294901760, %v441_v52  ;;  %v1886_v4 = vpack.c.bf16 %v206_v55, %v203_v37  ;;  %v257_v8 = vand.u32 4294901760, %v169_v56 }
  0x2c   : > { %1385 = vmatpush3.bf16.msra.mxu1 %v1384_v59  ;;  %v322_v6 = vsub.f32 %v1793_v46, %v2286_v61  ;;  %v329_v7 = vsub.f32 %v1817_v58, %v2284_v0  ;;  %v260_v13 = vand.u32 4294901760, %v170_v57  ;;  %v2283_v11 = vand.u32 4294901760, %v1821_v63 }
  0x2d   : > { %v1386_v19 = vpack.c.bf16 %v442_v3, %v435_v2  ;;  %1365 = vmatpush3.bf16.msra.mxu0 %v1886_v4  ;;  %v2282_v23 = vand.u32 4294901760, %v1842_v12  ;;  %v209_v24 = vand.u32 4294901760, %v153_v1  ;;  %v1903_v30 = vsub.f32 %v152_v29, %v206_v55  ;;  %v171_v29 = vld [vmem:[%s2280_s1 + $0xe0] sm:$0xff]  ;;  %v172_v55 = vld [vmem:[%s2280_s1 + $0xe8] sm:$0xff] }
  0x2e   : > { %v323_v37 = vand.u32 4294901760, %v322_v6  ;;  %v330_v47 = vand.u32 4294901760, %v329_v7  ;;  %v1905_v48 = vpack.c.bf16 %v260_v13, %v257_v8  ;;  %v1907_v51 = vsub.f32 %v169_v56, %v257_v8  ;;  %v155_v8 = vld [vmem:[%s2280_s1 + $0x60] sm:$0xff] }
  0x2f   : > { %1387 = vmatprep.subr.bf16.mxu1 %v1386_v19  ;;  %v448_v52 = vsub.f32 %v1821_v63, %v2283_v11  ;;  %v455_v59 = vsub.f32 %v1842_v12, %v2282_v23  ;;  %v212_v2 = vand.u32 4294901760, %v154_v18  ;;  %v1922_v3 = vsub.f32 %v170_v57, %v260_v13 }
  0x30   : > { %v1388_v56 = vpack.c.bf16 %v330_v47, %v323_v37  ;;  %1367 = vmatprep.subr.bf16.mxu0 %v1905_v48  ;;  %v2285_v6 = vand.u32 4294901760, %v1846_v17  ;;  %v2288_v7 = vand.u32 4294901760, %v1860_v42  ;;  %v1931_v0 = vsub.f32 %v153_v1, %v209_v24 }
  0x31   : > { %v449_v19 = vand.u32 4294901760, %v448_v52  ;;  %v456_v23 = vand.u32 4294901760, %v455_v59  ;;  %v1929_v11 = vpack.c.bf16 %v212_v2, %v209_v24  ;;  %v263_v37 = vand.u32 4294901760, %v171_v29  ;;  %v156_v52 = vld [vmem:[%s2280_s1 + $0x68] sm:$0xff] }
  0x32   : > { %1389 = vmatpush3.bf16.msra.mxu1 %v1388_v56  ;;  %v336_v57 = vsub.f32 %v1846_v17, %v2285_v6  ;;  %v343_v13 = vsub.f32 %v1860_v42, %v2288_v7  ;;  %v266_v47 = vand.u32 4294901760, %v172_v55  ;;  %v2292_v24 = vand.u32 4294901760, %v1864_v50 }
  0x33   : > { %v1390_v1 = vpack.c.bf16 %v456_v23, %v449_v19  ;;  %1369 = vmatpush3.bf16.msra.mxu0 %v1929_v11  ;;  %v2291_v59 = vand.u32 4294901760, %v1879_v60  ;;  %v215_v56 = vand.u32 4294901760, %v155_v8  ;;  %v1950_v6 = vsub.f32 %v154_v18, %v212_v2  ;;  %v173_v18 = vld [vmem:[%s2280_s1 + $0xf0] sm:$0xff]  ;;  %v174_v2 = vld [vmem:[%s2280_s1 + $0xf8] sm:$0xff] }
  0x34   : > { %v337_v61 = vand.u32 4294901760, %v336_v57  ;;  %v344_v34 = vand.u32 4294901760, %v343_v13  ;;  %v1952_v7 = vpack.c.bf16 %v266_v47, %v263_v37  ;;  %v1954_v33 = vsub.f32 %v171_v29, %v263_v37 }
  0x35   : > { %1391 = vmatprep.subr.bf16.mxu1 %v1390_v1  ;;  %v462_v23 = vsub.f32 %v1864_v50, %v2292_v24  ;;  %v469_v19 = vsub.f32 %v1879_v60, %v2291_v59  ;;  %v218_v10 = vand.u32 4294901760, %v156_v52  ;;  %v1970_v57 = vsub.f32 %v172_v55, %v266_v47  ;;  %v157_v1 = vld [vmem:[%s2280_s1 + $0x70] sm:$0xff] }
  0x36   : > { %2327 = vst [vmem:[#allocation5_spill] sm:$0xff] %v1952_v7  ;;  %v1392_v29 = vpack.c.bf16 %v344_v34, %v337_v61  ;;  %1371 = vmatprep.subr.bf16.mxu0 %v1952_v7  ;;  %v2295_v13 = vand.u32 4294901760, %v1888_v5  ;;  %v2296_v37 = vand.u32 4294901760, %v1903_v30  ;;  %v1979_v54 = vsub.f32 %v155_v8, %v215_v56 }
  0x37   : > { %v463_v59 = vand.u32 4294901760, %v462_v23  ;;  %v470_v24 = vand.u32 4294901760, %v469_v19  ;;  %v1977_v9 = vpack.c.bf16 %v218_v10, %v215_v56  ;;  %v269_v55 = vand.u32 4294901760, %v173_v18  ;;  %v158_v23 = vld [vmem:[%s2280_s1 + $0x78] sm:$0xff] }
  0x38   : > { %1393 = vmatpush3.bf16.msra.mxu1 %v1392_v29  ;;  %v350_v34 = vsub.f32 %v1888_v5, %v2295_v13  ;;  %v357_v61 = vsub.f32 %v1903_v30, %v2296_v37  ;;  %v272_v47 = vand.u32 4294901760, %v174_v2  ;;  %v2306_v56 = vand.u32 4294901760, %v1907_v51 }
  0x39   : > { %2328 = vst [vmem:[#allocation6_spill] sm:$0xff] %v1977_v9  ;;  %v1394_v8 = vpack.c.bf16 %v470_v24, %v463_v59  ;;  %1373 = vmatpush3.bf16.msra.mxu0 %v1977_v9  ;;  %v2304_v19 = vand.u32 4294901760, %v1922_v3  ;;  %v221_v29 = vand.u32 4294901760, %v157_v1  ;;  %v1996_v13 = vsub.f32 %v156_v52, %v218_v10 }
  0x3a   : > { %v351_v37 = vand.u32 4294901760, %v350_v34  ;;  %v358_v53 = vand.u32 4294901760, %v357_v61  ;;  %v1998_v36 = vpack.c.bf16 %v272_v47, %v269_v55  ;;  %v2000_v35 = vsub.f32 %v173_v18, %v269_v55 }
  0x3b   : > { %1395 = vmatprep.subr.bf16.mxu1 %v1394_v8  ;;  %v476_v24 = vsub.f32 %v1907_v51, %v2306_v56  ;;  %v483_v59 = vsub.f32 %v1922_v3, %v2304_v19  ;;  %v224_v44 = vand.u32 4294901760, %v158_v23  ;;  %v2009_v10 = vsub.f32 %v174_v2, %v272_v47 }
  0x3c   : > { %2329 = vst [vmem:[#allocation7_spill] sm:$0xff] %v1998_v36  ;;  %v1396_v9 = vpack.c.bf16 %v358_v53, %v351_v37  ;;  %1375 = vmatprep.subr.bf16.mxu0 %v1998_v36  ;;  %v2305_v52 = vand.u32 4294901760, %v1931_v0  ;;  %v2307_v18 = vand.u32 4294901760, %v1950_v6  ;;  %v2015_v8 = vsub.f32 %v157_v1, %v221_v29 }
  0x3d   : > { %v477_v34 = vand.u32 4294901760, %v476_v24  ;;  %v484_v61 = vand.u32 4294901760, %v483_v59  ;;  %v2013_v55 = vpack.c.bf16 %v224_v44, %v221_v29  ;;  %v176_v2 = vcombine.high %v142_v41, %v142_v41 }
  0x3e   : > { %1397 = vmatpush3.bf16.msra.mxu1 %v1396_v9  ;;  %v364_v19 = vsub.f32 %v1931_v0, %v2305_v52  ;;  %v371_v53 = vsub.f32 %v1950_v6, %v2307_v18  ;;  %v2023_v37 = vand.u32 4294901760, %v142_v41  ;;  %v2310_v24 = vand.u32 4294901760, %v1954_v33 }
  0x3f   : > { %2330 = vst [vmem:[#allocation8_spill] sm:$0xff] %v2013_v55  ;;  %v1398_v47 = vpack.c.bf16 %v484_v61, %v477_v34  ;;  %1377 = vmatpush3.bf16.msra.mxu0 %v2013_v55  ;;  %v2313_v1 = vand.u32 4294901760, %v1970_v57  ;;  %v1410_v9 = vpack.c.bf16 %v1770_v32, %v1768_v31  ;;  %v2030_v52 = vand.u32 4294901760, %v176_v2 }
  0x40   : > { %v365_v29 = vand.u32 4294901760, %v364_v19  ;;  %v372_v59 = vand.u32 4294901760, %v371_v53  ;;  %v2033_v56 = vsub.f32 %v142_v41, %v2023_v37  ;;  %v490_v34 = vsub.f32 %v1954_v33, %v2310_v24 }
  0x41   : > { %2331 = vst [vmem:[#allocation9_spill] sm:$0xff] %v2030_v52  ;;  %1399 = vmatprep.subr.bf16.mxu1 %v1398_v47  ;;  %v497_v61 = vsub.f32 %v1970_v57, %v2313_v1  ;;  %1411 = vmatprep.subr.bf16.mxu0 %v1410_v9  ;;  %v2314_v18 = vand.u32 4294901760, %v1979_v54  ;;  %v2315_v19 = vand.u32 4294901760, %v1996_v13  ;;  %v2043_v53 = vsub.f32 %v158_v23, %v224_v44 }
  0x42   : > { %2332 = vst [vmem:[#allocation10_spill] sm:$0xff] %v2033_v56  ;;  %v1400_v55 = vpack.c.bf16 %v372_v59, %v365_v29  ;;  %v2046_v41 = vsub.f32 %v176_v2, %v2030_v52  ;;  %v2318_v47 = vand.u32 4294901760, %v2033_v56  ;;  %515 = vmatprep.mubr.f32.mxu1 %v2030_v52  ;;  %v491_v24 = vand.u32 4294901760, %v490_v34 }
  0x43   : > { %v498_v36 = vand.u32 4294901760, %v497_v61  ;;  %v378_v9 = vsub.f32 %v1979_v54, %v2314_v18  ;;  %v385_v1 = vsub.f32 %v1996_v13, %v2315_v19  ;;  %v2323_v2 = vand.u32 4294901760, %v2000_v35 }
  0x44   : > { %1401 = vmatpush3.bf16.msra.mxu1 %v1400_v55  ;;  %v276_v44 = vand.u32 4294901760, %v2046_v41  ;;  %v283_v23 = vsub.f32 %v2033_v56, %v2318_v47  ;;  %v510_v29 = vand.u32 4294901760, %v2009_v10  ;;  %v2324_v56 = vand.u32 4294901760, %v2015_v8 }
  0x45   : > { %v1402_v59 = vpack.c.bf16 %v498_v36, %v491_v24  ;;  %v379_v34 = vand.u32 4294901760, %v378_v9  ;;  %v386_v61 = vand.u32 4294901760, %v385_v1  ;;  %v504_v19 = vsub.f32 %v2000_v35, %v2323_v2 }
  0x46   : > { %v277_v18 = vsub.f32 %v2046_v41, %v276_v44  ;;  %v511_v55 = vsub.f32 %v2009_v10, %v510_v29  ;;  %v284_v52 = vand.u32 4294901760, %v283_v23  ;;  %v398_v7 = vand.u32 4294901760, %v2043_v53 }
  0x47   : > { %1403 = vmatprep.subr.bf16.mxu1 %v1402_v59  ;;  %v1404_v47 = vpack.c.bf16 %v386_v61, %v379_v34  ;;  %v1412_v24 = vpack.c.bf16 %v1748_v21, %v1738_v15  ;;  %v505_v1 = vand.u32 4294901760, %v504_v19  ;;  %v1414_v2 = vpack.c.bf16 %v1761_v26, %v1759_v25 }
  0x48   : > { %v278_v36 = vand.u32 4294901760, %v277_v18  ;;  %v512_v9 = vand.u32 4294901760, %v511_v55  ;;  %v392_v59 = vsub.f32 %v2015_v8, %v2324_v56  ;;  %v399_v23 = vsub.f32 %v2043_v53, %v398_v7 }
  0x49   : > { %1405 = vmatpush3.bf16.msra.mxu1 %v1404_v47  ;;  %v1416_v19 = vpack.c.bf16 %v1778_v38, %v1765_v28  ;;  %v1418_v47 = vpack.c.bf16 %v1788_v43, %v1782_v40  ;;  %v1420_v56 = vpack.c.bf16 %v1817_v58, %v1793_v46 }
  0x4a   : > { %279 = vmatprep.mubr.f32.mxu0 %v278_v36  ;;  %v1406_v34 = vpack.c.bf16 %v512_v9, %v505_v1  ;;  %v393_v18 = vand.u32 4294901760, %v392_v59  ;;  %v400_v61 = vand.u32 4294901760, %v399_v23  ;;  %v2333_v36 = vand.u32 4294901760, %v1768_v31 }
  0x4b   : > { %285 = vmatmul.mubr.f32.vlgmr.msra.gmra.mrb[0].mxu0 %v284_v52  ;;  %v2334_v52 = vand.u32 4294901760, %v1770_v32  ;;  %v2336_v9 = vand.u32 4294901760, %v1748_v21  ;;  %v2337_v23 = vand.u32 4294901760, %v1759_v25  ;;  %v2341_v31 = vand.u32 4294901760, %v1782_v40 }
  0x4c   : > { %1413 = vmatpush3.bf16.msra.mxu0 %v1412_v24  ;;  %1407 = vmatprep.subr.bf16.mxu1 %v1406_v34  ;;  %v1408_v55 = vpack.c.bf16 %v400_v61, %v393_v18  ;;  %v2335_v24 = vand.u32 4294901760, %v1738_v15  ;;  %v2339_v18 = vand.u32 4294901760, %v1765_v28  ;;  %v2340_v61 = vand.u32 4294901760, %v1778_v38 }
  0x4d   : > { %1415 = vmatprep.subr.bf16.mxu0 %v1414_v2  ;;  %652 = vmatprep.mubr.f32.mxu0 %v2046_v41  ;;  %v1474_v1 = vpack.c.bf16 %v2334_v52, %v2333_v36  ;;  %v2338_v2 = vand.u32 4294901760, %v1761_v26  ;;  %v2342_v32 = vand.u32 4294901760, %v1788_v43  ;;  %v2343_v15 = vand.u32 4294901760, %v1793_v46 }
  0x4e   : > { %v1476_v59 = vpack.c.bf16 %v2336_v9, %v2335_v24  ;;  %v1480_v41 = vpack.c.bf16 %v2340_v61, %v2339_v18  ;;  %1409 = vmatpush3.bf16.msra.mxu1 %v1408_v55  ;;  %v2344_v21 = vand.u32 4294901760, %v1817_v58  ;;  %v2345_v25 = vand.u32 4294901760, %v1821_v63 }
  0x4f   : > { %v1478_v34 = vpack.c.bf16 %v2338_v2, %v2337_v23  ;;  %v1482_v36 = vpack.c.bf16 %v2342_v32, %v2341_v31  ;;  %v2346_v26 = vand.u32 4294901760, %v1842_v12  ;;  %v2347_v28 = vand.u32 4294901760, %v1846_v17  ;;  %1443 = vmatprep.subr.bf16.mxu1 %v1736_v14 }
  0x50   : > { %v1484_v52 = vpack.c.bf16 %v2344_v21, %v2343_v15  ;;  %v2348_v38 = vand.u32 4294901760, %v1860_v42  ;;  %v2349_v40 = vand.u32 4294901760, %v1864_v50  ;;  %v2350_v43 = vand.u32 4294901760, %v1879_v60  ;;  %1417 = vmatpush3.bf16.msra.mxu0 %v1416_v19 }
  0x51   : > { %v1486_v24 = vpack.c.bf16 %v2346_v26, %v2345_v25  ;;  %v2351_v46 = vand.u32 4294901760, %v1888_v5  ;;  %v2352_v58 = vand.u32 4294901760, %v1903_v30  ;;  %v2353_v2 = vand.u32 4294901760, %v1907_v51  ;;  %1419 = vmatprep.subr.bf16.mxu0 %v1418_v47  ;;  %517 = vmatmul.mubr.f32.vlgmr.msra.gmra.mrb[0].mxu1 %v2023_v37 }
  0x52   : > { %v1488_v9 = vpack.c.bf16 %v2348_v38, %v2347_v28  ;;  %v1490_v55 = vpack.c.bf16 %v2350_v43, %v2349_v40  ;;  %v2354_v18 = vand.u32 4294901760, %v1922_v3  ;;  %v2355_v31 = vand.u32 4294901760, %v1931_v0  ;;  %1445 = vmatpush3.bf16.msra.mxu1 %v1746_v20  ;;  %759 = vmatprep.mubr.f32.mxu1 %v276_v44 }
  0x53   : > { %v1492_v23 = vpack.c.bf16 %v2352_v58, %v2351_v46  ;;  %v2356_v32 = vand.u32 4294901760, %v1950_v6  ;;  %v1422_v19 = vpack.c.bf16 %v1842_v12, %v1821_v63  ;;  %v2357_v21 = vand.u32 4294901760, %v1979_v54  ;;  %1447 = vmatprep.subr.bf16.mxu1 %v1750_v22 }
  0x54   : > { %v1494_v61 = vpack.c.bf16 %v2354_v18, %v2353_v2  ;;  %v2358_v25 = vand.u32 4294901760, %v1996_v13  ;;  %1421 = vmatpush3.bf16.msra.mxu0 %v1420_v56  ;;  %v1424_v47 = vpack.c.bf16 %v1860_v42, %v1846_v17  ;;  %v1426_v63 = vpack.c.bf16 %v1879_v60, %v1864_v50 }
  0x55   : > { %v2137_v15 = vpack.c.bf16 %v2356_v32, %v2355_v31  ;;  %1423 = vmatprep.subr.bf16.mxu0 %v1422_v19  ;;  %v1428_v12 = vpack.c.bf16 %v1903_v30, %v1888_v5  ;;  %v1430_v56 = vpack.c.bf16 %v1922_v3, %v1907_v51  ;;  %v1432_v17 = vpack.c.bf16 %v1950_v6, %v1931_v0  ;;  %v2359_v5 = vld [vmem:[#allocation5_spill] sm:$0xff]  ;;  %v2361_v30 = vld [vmem:[#allocation6_spill] sm:$0xff]  ;;  %v2362_v51 = vld [vmem:[#allocation7_spill] sm:$0xff] }
  0x56   : > { %v2145_v26 = vpack.c.bf16 %v2358_v25, %v2357_v21  ;;  %1449 = vmatpush3.bf16.msra.mxu1 %v1763_v27  ;;  %v1434_v42 = vpack.c.bf16 %v1970_v57, %v1954_v33  ;;  %v1436_v50 = vpack.c.bf16 %v1996_v13, %v1979_v54  ;;  %v1438_v60 = vpack.c.bf16 %v2009_v10, %v2000_v35  ;;  %v2360_v54 = vld [vmem:[#allocation10_spill] sm:$0xff]  ;;  %v2363_v3 = vld [vmem:[#allocation9_spill] sm:$0xff]  ;;  %v2364_v6 = vld [vmem:[#allocation8_spill] sm:$0xff] }
  0x57   : > { %1451 = vmatprep.subr.bf16.mxu1 %v1780_v39  ;;  %v1440_v0 = vpack.c.bf16 %v2043_v53, %v2015_v8  ;;  %v2365_v13 = vand.u32 4294901760, %v2360_v54 }
  0x58   : > { %1425 = vmatpush3.bf16.msra.mxu0 %v1424_v47 }
  0x59   : > { %1427 = vmatprep.subr.bf16.mxu0 %v1426_v63 }
  0x5a   : > { %1453 = vmatpush3.bf16.msra.mxu1 %v1791_v45 }
  0x5b   : > { %1455 = vmatprep.subr.bf16.mxu1 %v1819_v62 }
  0x5c   : > { %1429 = vmatpush3.bf16.msra.mxu0 %v1428_v12 }
  0x5d   : > { %1431 = vmatprep.subr.bf16.mxu0 %v1430_v56 }
  0x5e   : > { %1457 = vmatpush3.bf16.msra.mxu1 %v1844_v16 }
  0x5f   : > { %1459 = vmatprep.subr.bf16.mxu1 %v1862_v49 }
  0x60   : > { %1433 = vmatpush3.bf16.msra.mxu0 %v1432_v17 }
  0x61   : > { %1435 = vmatprep.subr.bf16.mxu0 %v1434_v42 }
  0x62   : > { %1461 = vmatpush3.bf16.msra.mxu1 %v1886_v4 }
  0x63   : > { %1463 = vmatprep.subr.bf16.mxu1 %v1905_v48 }
  0x64   : > { %1437 = vmatpush3.bf16.msra.mxu0 %v1436_v50 }
  0x65   : > { %1439 = vmatprep.subr.bf16.mxu0 %v1438_v60 }
  0x66   : > { %1465 = vmatpush3.bf16.msra.mxu1 %v1929_v11 }
  0x67   : > { %1467 = vmatprep.subr.bf16.mxu1 %v2359_v5 }
  0x68   : > { %1441 = vmatpush3.bf16.msra.mxu0 %v1440_v0 }
  0x69   : > { %1475 = vmatprep.subr.bf16.mxu0 %v1474_v1 }
  0x6a   : > { %1469 = vmatpush3.bf16.msra.mxu1 %v2361_v30 }
  0x6b   : > { %655 = vmatmul.mubr.f32.vlgmr.msra.gmra.mrb[2].mxu0 %v2360_v54  ;;  %1471 = vmatprep.subr.bf16.mxu1 %v2362_v51 }
  0x6c   : > { %1477 = vmatpush3.bf16.msra.mxu0 %v1476_v59  ;;  %929 = vmatprep.mubr.f32.mxu0 %v2363_v3 }
  0x6d   : > { %1479 = vmatprep.subr.bf16.mxu0 %v1478_v34 }
  0x6e   : > { %1473 = vmatpush3.bf16.msra.mxu1 %v2364_v6 }
  0x6f   : > { %1507 = vmatprep.subr.bf16.mxu1 %v1736_v14  ;;  %v2366_v14 = vand.u32 4294901760, %v1954_v33 }
  0x70   : > { %1481 = vmatpush3.bf16.msra.mxu0 %v1480_v41 }
  0x71   : > { %1483 = vmatprep.subr.bf16.mxu0 %v1482_v36  ;;  %763 = vmatmul.mubr.f32.vlgmr.msra.gmra.mrb[2].mxu1 %v2365_v13 }
  0x72   : > { %1509 = vmatpush3.bf16.msra.mxu1 %v1746_v20  ;;  %1033 = vmatprep.mubr.f32.mxu1 %v2363_v3  ;;  %v2367_v20 = vand.u32 4294901760, %v1970_v57 }
  0x73   : > { %1511 = vmatprep.subr.bf16.mxu1 %v1750_v22  ;;  %v2368_v22 = vand.u32 4294901760, %v2000_v35  ;;  %v1645_v35 = vmov 0.0  }
  0x74   : > { %1485 = vmatpush3.bf16.msra.mxu0 %v1484_v52  ;;  %v1498_v44 = vpack.c.bf16 %v2367_v20, %v2366_v14  ;;  %1128 = vst.msk [vmem:[%s2221_s7 + $0x4] sm:$0xf] %vm1041_vm0, %v1645_v35 }
  0x75   : > { %1487 = vmatprep.subr.bf16.mxu0 %v1486_v24 }
  0x76   : > { %1513 = vmatpush3.bf16.msra.mxu1 %v1763_v27  ;;  %v1502_v27 = vpack.c.bf16 %v510_v29, %v2368_v22 }
  0x77   : > { %1515 = vmatprep.subr.bf16.mxu1 %v1780_v39  ;;  %v2369_v39 = vand.u32 4294901760, %v2015_v8 }
  0x78   : > { %1489 = vmatpush3.bf16.msra.mxu0 %v1488_v9 }
  0x79   : > { %1491 = vmatprep.subr.bf16.mxu0 %v1490_v55 }
  0x7a   : > { %1517 = vmatpush3.bf16.msra.mxu1 %v1791_v45  ;;  %v1504_v45 = vpack.c.bf16 %v398_v7, %v2369_v39 }
  0x7b   : > { %1519 = vmatprep.subr.bf16.mxu1 %v1819_v62 }
  0x7c   : > { %1493 = vmatpush3.bf16.msra.mxu0 %v1492_v23 }
  0x7d   : > { %1495 = vmatprep.subr.bf16.mxu0 %v1494_v61 }
  0x7e   : > { %1521 = vmatpush3.bf16.msra.mxu1 %v1844_v16 }
  0x7f   : > { %1523 = vmatprep.subr.bf16.mxu1 %v1862_v49 }
  0x80   : > { %1497 = vmatpush3.bf16.msra.mxu0 %v2137_v15 }
  0x81   : > { %1499 = vmatprep.subr.bf16.mxu0 %v1498_v44 }
  0x82   : > { %1525 = vmatpush3.bf16.msra.mxu1 %v1886_v4 }
  0x83   : > { %1527 = vmatprep.subr.bf16.mxu1 %v1905_v48 }
  0x84   : > { %1501 = vmatpush3.bf16.msra.mxu0 %v2145_v26 }
  0x85   : > { %1503 = vmatprep.subr.bf16.mxu0 %v1502_v27 }
  0x86   : > { %1529 = vmatpush3.bf16.msra.mxu1 %v1929_v11 }
  0x87   : > { %1531 = vmatprep.subr.bf16.mxu1 %v2359_v5 }
  0x88   : > { %1505 = vmatpush3.bf16.msra.mxu0 %v1504_v45 }
  0x8a   : > { %1533 = vmatpush3.bf16.msra.mxu1 %v2361_v30 }
  0x8b   : > { %931 = vmatmul.mubr.f32.vlgmr.msra.gmra.mrb[4].mxu0 %v2023_v37  ;;  %1535 = vmatprep.subr.bf16.mxu1 %v2362_v51 }
  0x8e   : > { %1537 = vmatpush3.bf16.msra.mxu1 %v2364_v6 }
  0x91   : > { %1035 = vmatmul.mubr.f32.vlgmr.msra.gmra.mrb[4].mxu1 %v2023_v37 }
 0x11e   : > { %v1168_v62 = vpop.f32.mrb[0].mxu0 }
 0x11f   : > { %v1169_v16 = vpop.f32.mrb[1].mxu0 }
 0x120   : > { %v1170_v33 = vadd.f32 %v1169_v16, %v1168_v62 }
 0x124   : > { %v1203_v49 = vpop.f32.mrb[0].mxu1 }
 0x125   : > { %v1204_v4 = vpop.f32.mrb[1].mxu1 }
 0x126   : > { %v1205_v11 = vadd.f32 %v1204_v4, %v1203_v49 }
 0x128   : > { %v519_v48 = vadd.f32 %v1205_v11, %v1170_v33 }
 0x13e   : > { %v1238_v7 = vpop.f32.mrb[2].mxu0 }
 0x13f   : > { %v1239_v57 = vpop.f32.mrb[3].mxu0 }
 0x140   : > { %v1240_v10 = vadd.f32 %v1239_v57, %v1238_v7 }
 0x142   : > { %v657_v8 = vadd.f32 %v1240_v10, %v519_v48 }
 0x144   : > { %v1273_v37 = vpop.f32.mrb[2].mxu1 }
 0x145   : > { %v1274_v53 = vpop.f32.mrb[3].mxu1 }
 0x146   : > { %v1275_v29 = vadd.f32 %v1274_v53, %v1273_v37 }
 0x148   : > { %v765_v1 = vadd.f32 %v1275_v29, %v657_v8 }
 0x15e   : > { %v1308_v59 = vpop.f32.mrb[4].mxu0 }
 0x15f   : > { %v1309_v34 = vpop.f32.mrb[5].mxu0 }
 0x160   : > { %v1310_v41 = vadd.f32 %v1309_v34, %v1308_v59 }
 0x162   : > { %v933_v36 = vadd.f32 %v1310_v41, %v765_v1 }
 0x164   : > { %v1343_v52 = vpop.f32.mrb[4].mxu1 }
 0x165   : > { %v1344_v24 = vpop.f32.mrb[5].mxu1 }
 0x166   : > { %v1345_v28 = vadd.f32 %v1344_v24, %v1343_v52 }
 0x168   : > { %v1037_v38 = vadd.f32 %v1345_v28, %v933_v36 }
 0x16a   : > { %v1040_v9 = vmul.f32 0.25, %v1037_v38 }
 0x16c   : > { %1042 = vst.msk [vmem:[%s2221_s7] sm:$0xf] %vm1041_vm0, %v1040_v9 }
 0x16d   : > { %1594 = shalt.err (!%p1591_p3)
}
 0x16e   : > { %s1595_s26 = scalar_lea.hbm %s2230_s21, 128  ;;  %s1599_s29 = scalar_lea.hbm %s2281_s2, 256 }
 0x16f   : > { %p1596_p4 = scmp.ne.s32.totalorder %s2230_s21, %s1595_s26  ;;  %p1600_p9 = scmp.lt.u32.totalorder %s2230_s21, %s2281_s2 }
 0x170   : > { %p1601_p10 = scmp.lt.u32.totalorder %s1599_s29, %s1595_s26  ;;  %p1603_p12 = scmp.lt.u32.totalorder %s1595_s26, %s2230_s21 }
 0x171   : > { %p1597_p7 = pnand %p1596_p4, %p1702_p5 }
 0x172   : > { %p1602_p11 = por %p1601_p10, %p1600_p9 }
 0x173   : > { %p1598_p8 = pneg %p1597_p7 }
 0x174   : > { %p1604_p13 = por %p1603_p12, %p1602_p11 }
 0x176   : > { %p1605_p0 = pnand %p1604_p13, %p1598_p8 }
 0x178   : > { %1608 = shalt.err (!%p1605_p0)
}
 0x179   : > { %s1647_s4 = smov 64   ;;  %s1648_s5 = smov 4  }
 0x17a   : > { %1538 = dma.vmem_to_hbm [thread:$0]  (%p1702_p5), %s2232_s14, 128, %s2230_s21, %s2238_s22, %s1647_s4, %s1647_s4, %s1648_s5  }
 0x17b PF: > { %p1544_p1 = scmp.ge.s32.totalorder %s1643_s12, 2  ;;  %s1074_s6 = sand.u32 1, %s1631_s9  }
 0x17c   : > { %s1075_s7 = scalar_lea.sflag [#allocation3], %s1074_s6 }
 0x17d   : > { %p1541_p2 = pnand %p1544_p1, %p1706_p6 }
 0x17f   : > { %1626 = dma.done.wait (!%p1541_p2), %s1075_s7, 128  }
 0x180   : > { %1628 = vsyncadd (!%p1541_p2), %s1075_s7, 4294967168  ;;  %p12_p3 = scmp.ge.s32.totalorder %s1689_s15, 4   ;;  %s2370_s9 = smov %s1635_s10 }
 0x181   : > { %s2371_s10 = smov %s1639_s11  ;;  %s2372_s11 = smov %s1700_s18 }
 0x182   : > { %s2373_s12 = smov %s1689_s15  ;;  %14 = sbr.rel (!%p12_p3) target bundleno = 3 (0x3), region = 64 }
 0x189   :  { %1080 = vsyncpa [#allocation3], 1 }
 0x18a   :  { %1082 = vsyncpa [#allocation3 + $0x1], 1 }

</bundles_post_ra>
